<compile_context>
chip_gen: v7x
topology: tpu7x:2x2x1
jax: 0.10.0
libtpu: 0.0.40
codegen_flags: <defaults>
</compile_context>

<pallas_src>
import functools
import math

import jax
import jax.numpy as jnp
from jax.experimental import pallas as pl
from jax.experimental.pallas import tpu as pltpu


def _round_up(n, m):
    return ((n + m - 1) // m) * m


def _padded_batch(b):
    # sublane-pad to 8; when splitting across batch blocks (v7x 2nd core), pad to 16
    return 8 if b <= 8 else _round_up(b, 16)


def _lstm_seq_kernel(gx_ref, h0_ref, c0_ref, whh_ref,      # inputs
                     y_ref, h_fin_ref, c_fin_ref,          # outputs
                     h_sc, c_sc,                           # VMEM scratch (carry)
                     *, total_steps, chunk_steps, padded_steps):
    n = pl.program_id(1)   # time-chunk index (axis 0 is the parallel batch-block axis)

    # Load the initial recurrent state into VMEM scratch at the start of each
    # batch block's sequence.
    @pl.when(n == 0)
    def _init():
        h_sc[...] = h0_ref[...]
        c_sc[...] = c0_ref[...]

    BB, H = h_sc.shape
    G = 4 * H

    # Hoisted constants (one per kernel invocation, not per step):
    # gate order is PyTorch's [i, f, g, o]; only g uses tanh, the rest sigmoid.
    lane = jax.lax.broadcasted_iota(jnp.int32, (BB, G), 1)
    is_g = (lane >= 2 * H) & (lane < 3 * H)
    # sigmoid(x) = 0.5 * tanh(0.5 * x) + 0.5  -> one tanh pass over the whole tile
    scale = jnp.where(is_g, jnp.float32(1.0), jnp.float32(0.5))

    w_hh = whh_ref[...]                        # (H, 4H), resident in VMEM

    # Fully unrolled step loop (static chunk_steps -> static indices into the
    # gx / y chunk blocks; state carried through VMEM refs).
    for u in range(chunk_steps):
        h = h_sc[...]
        c = c_sc[...]

        # Recurrent projection only; input projection + bias precomputed in gx.
        gates = gx_ref[u] + jnp.dot(h, w_hh, preferred_element_type=jnp.float32)

        th = jnp.tanh(gates * scale)                       # single EUP pass
        acts = jnp.where(is_g, th, 0.5 * th + 0.5)         # [i, f, g, o]

        i_gate = acts[:, 0 * H:1 * H]
        f_gate = acts[:, 1 * H:2 * H]
        g_gate = acts[:, 2 * H:3 * H]
        o_gate = acts[:, 3 * H:4 * H]

        c_new = f_gate * c + i_gate * g_gate
        h_new = o_gate * jnp.tanh(c_new)

        y_ref[u] = h_new                                   # VMEM; HBM DMA once per chunk

        if padded_steps == total_steps:
            h_sc[...] = h_new
            c_sc[...] = c_new
        else:
            # Time axis was padded: do not advance the state on padded steps.
            valid = (n * chunk_steps + u) < total_steps
            h_sc[...] = jnp.where(valid, h_new, h)
            c_sc[...] = jnp.where(valid, c_new, c)

    # Final-state outputs have constant time-chunk block index -> HBM writeback
    # only at the end of each batch block's sequence.
    h_fin_ref[...] = h_sc[...]
    c_fin_ref[...] = c_sc[...]


@jax.jit
def lstm_pallas_seq(x_seq, h0, c0, w_ih_t, w_hh_t, bias):
    """Run T LSTM-cell steps with the recurrence fused into one pallas_call.

    x_seq:  (T, B, I) f32
    h0, c0: (B or Bp, H) f32  (already-padded state is accepted and preserved)
    w_ih_t: (I, 4H) f32   (W_ih^T, PyTorch gate order [i, f, g, o])
    w_hh_t: (H, 4H) f32   (W_hh^T)
    bias:   (1, 4H) f32   (bias_ih + bias_hh)
    Returns (y_seq (T, B, H), h_final (Bp, H) padded, c_final (Bp, H) padded).
    """
    T, B, I = x_seq.shape
    H = w_hh_t.shape[0]
    G = 4 * H

    # Batch padding & per-core batch split (leading "parallel" axis; 2 blocks
    # only when B > 8 so single-TC chips never pay extra sequential iterations).
    Bp = _padded_batch(B)
    NB = 1 if Bp == 8 else 2
    BB = Bp // NB

    # Time chunking: U unrolled steps per grid iteration.
    U = min(T, 16)
    T_pad = _round_up(T, U)
    NC = T_pad // U

    # Hoisted input projection + bias: one batched MXU pass for all T steps.
    gx = jnp.dot(x_seq.reshape(T * B, I), w_ih_t,
                 preferred_element_type=jnp.float32,
                 precision=jax.lax.Precision.HIGHEST) + bias
    gx = gx.reshape(T, B, G)

    if Bp != B:
        gx = jnp.pad(gx, ((0, 0), (0, Bp - B), (0, 0)))
    if h0.shape[0] != Bp:
        h0 = jnp.pad(h0, ((0, Bp - h0.shape[0]), (0, 0)))
        c0 = jnp.pad(c0, ((0, Bp - c0.shape[0]), (0, 0)))
    if T_pad != T:
        gx = jnp.pad(gx, ((0, T_pad - T), (0, 0), (0, 0)))

    kernel = functools.partial(_lstm_seq_kernel,
                               total_steps=T, chunk_steps=U, padded_steps=T_pad)

    y, h_fin, c_fin = pl.pallas_call(
        kernel,
        out_shape=(
            jax.ShapeDtypeStruct((T_pad, Bp, H), jnp.float32),
            jax.ShapeDtypeStruct((Bp, H), jnp.float32),
            jax.ShapeDtypeStruct((Bp, H), jnp.float32),
        ),
        grid_spec=pltpu.PrefetchScalarGridSpec(
            num_scalar_prefetch=0,
            grid=(NB, NC),
            in_specs=[
                pl.BlockSpec((U, BB, G), lambda b, n: (n, b, 0)),   # gates_x chunk (lane-dense)
                pl.BlockSpec((BB, H), lambda b, n: (b, 0)),         # h0 (read at n==0)
                pl.BlockSpec((BB, H), lambda b, n: (b, 0)),         # c0 (read at n==0)
                pl.BlockSpec((H, G), lambda b, n: (0, 0)),          # W_hh^T resident in VMEM
            ],
            out_specs=[
                pl.BlockSpec((U, BB, H), lambda b, n: (n, b, 0)),   # per-chunk hidden slab
                pl.BlockSpec((BB, H), lambda b, n: (b, 0)),         # final h
                pl.BlockSpec((BB, H), lambda b, n: (b, 0)),         # final c
            ],
            scratch_shapes=[
                pltpu.VMEM((BB, H), jnp.float32),                   # h carry
                pltpu.VMEM((BB, H), jnp.float32),                   # c carry
            ],
        ),
        compiler_params=pltpu.CompilerParams(
            dimension_semantics=("parallel", "arbitrary")),  # batch parallel, time sequential
    )(gx, h0, c0, w_hh_t)

    return y[:T, :B], h_fin, c_fin


class CoreNetwork:
    """JAX/Pallas port of the PyTorch CoreNetwork (1-layer LSTM, seq_len=1)."""

    def __init__(self, input_size, hidden_size, key):
        self.num_layers = 1
        self.input_size = input_size
        self.hidden_size = hidden_size
        self._batch = None
        self._h = None        # padded (Bp, H) recurrent state kept between calls
        self._c = None

        # Deterministic init matching PyTorch LSTM default: U(-k, k), k = 1/sqrt(H)
        k = 1.0 / math.sqrt(hidden_size)
        k_wih, k_whh, k_bih, k_bhh = jax.random.split(key, 4)
        w_ih = jax.random.uniform(k_wih, (4 * hidden_size, input_size),
                                  jnp.float32, -k, k)
        w_hh = jax.random.uniform(k_whh, (4 * hidden_size, hidden_size),
                                  jnp.float32, -k, k)
        b_ih = jax.random.uniform(k_bih, (4 * hidden_size,), jnp.float32, -k, k)
        b_hh = jax.random.uniform(k_bhh, (4 * hidden_size,), jnp.float32, -k, k)

        self.w_ih_t = w_ih.T                                    # (I, 4H)
        self.w_hh_t = w_hh.T                                    # (H, 4H)
        self.bias = (b_ih + b_hh).reshape(1, 4 * hidden_size)   # (1, 4H)

    @property
    def hidden_state(self):
        if self._h is None:
            return None
        return self._h[None, :self._batch]      # (1, B, H), PyTorch-style

    @property
    def cell_state(self):
        if self._c is None:
            return None
        return self._c[None, :self._batch]

    def reset(self, batch_size):
        self._batch = batch_size
        Bp = _padded_batch(batch_size)
        self._h = jnp.zeros((Bp, self.hidden_size), jnp.float32)
        self._c = jnp.zeros((Bp, self.hidden_size), jnp.float32)

    def forward(self, g_t):
        # g_t: (B, I). seq_len == 1, so the LSTM output equals the new hidden state.
        y, self._h, self._c = lstm_pallas_seq(g_t[None], self._h, self._c,
                                              self.w_ih_t, self.w_hh_t, self.bias)
        return jnp.squeeze(y)                   # matches output.squeeze()

    def forward_sequence(self, g_seq):
        """Fused rollout: all T steps in one pallas_call. g_seq: (T, B, I)."""
        y, self._h, self._c = lstm_pallas_seq(g_seq, self._h, self._c,
                                              self.w_ih_t, self.w_hh_t, self.bias)
        return y


def _lstm_cell_reference(x, h, c, w_ih_t, w_hh_t, bias):
    gates = (jnp.dot(x, w_ih_t, precision=jax.lax.Precision.HIGHEST)
             + jnp.dot(h, w_hh_t, precision=jax.lax.Precision.HIGHEST) + bias)
    H = h.shape[1]
    i = jax.nn.sigmoid(gates[:, 0:H])
    f = jax.nn.sigmoid(gates[:, H:2 * H])
    g = jnp.tanh(gates[:, 2 * H:3 * H])
    o = jax.nn.sigmoid(gates[:, 3 * H:4 * H])
    c_new = f * c + i * g
    h_new = o * jnp.tanh(c_new)
    return h_new, c_new


def _reference_rollout(g_seq, w_ih_t, w_hh_t, bias, hidden_size):
    T, B, _ = g_seq.shape
    h = jnp.zeros((B, hidden_size), jnp.float32)
    c = jnp.zeros((B, hidden_size), jnp.float32)
    ys = []
    for t in range(T):
        h, c = _lstm_cell_reference(g_seq[t], h, c, w_ih_t, w_hh_t, bias)
        ys.append(h)
    return jnp.stack(ys), h, c


if __name__ == "__main__":
    key = jax.random.PRNGKey(0)
    k_param, k_in, k_in2 = jax.random.split(key, 3)

    batch, input_size, hidden_size, seq_len = 4, 16, 32, 8
    g_seq = jax.random.normal(k_in, (seq_len, batch, input_size), jnp.float32)

    # --- Per-step use (matches the PyTorch forward() semantics). ---
    net = CoreNetwork(input_size, hidden_size, k_param)
    net.reset(batch)
    step_outs = []
    for t in range(seq_len):
        step_outs.append(net.forward(g_seq[t]))
    step_outs = jax.block_until_ready(jnp.stack(step_outs))          # (T, B, H)

    # --- Fused multi-step rollout: one pallas_call for all T steps. ---
    net2 = CoreNetwork(input_size, hidden_size, k_param)
    net2.reset(batch)
    y_seq = jax.block_until_ready(net2.forward_sequence(g_seq))      # (T, B, H)

    y_ref, h_ref, c_ref = _reference_rollout(g_seq, net.w_ih_t, net.w_hh_t,
                                             net.bias, hidden_size)

    assert step_outs.shape == (seq_len, batch, hidden_size)
    assert y_seq.shape == (seq_len, batch, hidden_size)
    assert jnp.allclose(step_outs, y_ref, atol=1e-5, rtol=1e-5)
    assert jnp.allclose(y_seq, y_ref, atol=1e-5, rtol=1e-5)
    assert jnp.allclose(net.hidden_state[0], h_ref, atol=1e-5, rtol=1e-5)
    assert jnp.allclose(net.cell_state[0], c_ref, atol=1e-5, rtol=1e-5)
    assert jnp.allclose(net2.hidden_state[0], h_ref, atol=1e-5, rtol=1e-5)
    assert jnp.allclose(net2.cell_state[0], c_ref, atol=1e-5, rtol=1e-5)

    # --- Larger config: exercises the split-batch (parallel) axis, multi-chunk
    #     time grid, and the padded-time masking path. ---
    batch2, seq_len2 = 12, 20
    g_seq2 = jax.random.normal(k_in2, (seq_len2, batch2, input_size), jnp.float32)
    net3 = CoreNetwork(input_size, hidden_size, k_param)
    net3.reset(batch2)
    y_seq2 = jax.block_until_ready(net3.forward_sequence(g_seq2))
    y_ref2, h_ref2, c_ref2 = _reference_rollout(g_seq2, net3.w_ih_t, net3.w_hh_t,
                                                net3.bias, hidden_size)
    assert y_seq2.shape == (seq_len2, batch2, hidden_size)
    assert jnp.allclose(y_seq2, y_ref2, atol=1e-5, rtol=1e-5)
    assert jnp.allclose(net3.hidden_state[0], h_ref2, atol=1e-5, rtol=1e-5)
    assert jnp.allclose(net3.cell_state[0], c_ref2, atol=1e-5, rtol=1e-5)

    print("KERNEL_OK")
</pallas_src>

<mosaic_0001>
module attributes {stable_mosaic.version = 11 : i64} {
  func.func @_lstm_seq_kernel(%arg0: i32, %arg1: i32, %arg2: memref<1x8x128xf32, #tpu.memory_space<vmem>>, %arg3: memref<8x32xf32, #tpu.memory_space<vmem>>, %arg4: memref<8x32xf32, #tpu.memory_space<vmem>>, %arg5: memref<32x128xf32, #tpu.memory_space<vmem>>, %arg6: memref<1x8x32xf32, #tpu.memory_space<vmem>>, %arg7: memref<8x32xf32, #tpu.memory_space<vmem>>, %arg8: memref<8x32xf32, #tpu.memory_space<vmem>>, %arg9: memref<8x32xf32, #tpu.memory_space<vmem>>, %arg10: memref<8x32xf32, #tpu.memory_space<vmem>>) attributes {dimension_semantics = [#tpu.dimension_semantics<parallel>, #tpu.dimension_semantics<arbitrary>], iteration_bounds = array<i64: 1, 1>, scalar_prefetch = 0 : i64, scratch_operands = 2 : i64, tpu.core_type = #tpu.core_type<tc>, window_params = [{transform_indices = @transform_0, window_bounds = array<i64: 1, 8, 128>}, {transform_indices = @transform_1, window_bounds = array<i64: 8, 32>}, {transform_indices = @transform_2, window_bounds = array<i64: 8, 32>}, {pipeline_mode = #tpu.pipeline_mode<synchronous>, transform_indices = @transform_3, window_bounds = array<i64: 32, 128>}, {transform_indices = @transform_4, window_bounds = array<i64: 1, 8, 32>}, {transform_indices = @transform_5, window_bounds = array<i64: 8, 32>}, {transform_indices = @transform_6, window_bounds = array<i64: 8, 32>}]} {
    %c0_i32 = arith.constant 0 : i32
    %0 = arith.cmpi eq, %arg1, %c0_i32 : i32
    %1 = arith.extui %0 : i1 to i32
    %c0_i32_0 = arith.constant 0 : i32
    %2 = arith.cmpi ne, %1, %c0_i32_0 : i32
    scf.if %2 {
      %c0_28 = arith.constant 0 : index
      %c0_29 = arith.constant 0 : index
      %44 = vector.load %arg3[%c0_28, %c0_29] : memref<8x32xf32, #tpu.memory_space<vmem>>, vector<8x32xf32>
      %c0_30 = arith.constant 0 : index
      %c0_31 = arith.constant 0 : index
      %45 = vector.load %arg9[%c0_30, %c0_31] : memref<8x32xf32, #tpu.memory_space<vmem>>, vector<8x32xf32>
      tpu.vector_store %arg9[%c0_30, %c0_31], %44 {strides = array<i32>} : memref<8x32xf32, #tpu.memory_space<vmem>>, vector<8x32xf32>,
      %c0_32 = arith.constant 0 : index
      %c0_33 = arith.constant 0 : index
      %46 = vector.load %arg4[%c0_32, %c0_33] : memref<8x32xf32, #tpu.memory_space<vmem>>, vector<8x32xf32>
      %c0_34 = arith.constant 0 : index
      %c0_35 = arith.constant 0 : index
      %47 = vector.load %arg10[%c0_34, %c0_35] : memref<8x32xf32, #tpu.memory_space<vmem>>, vector<8x32xf32>
      tpu.vector_store %arg10[%c0_34, %c0_35], %46 {strides = array<i32>} : memref<8x32xf32, #tpu.memory_space<vmem>>, vector<8x32xf32>,
    } else {
    }
    %3 = tpu.iota {dimensions = array<i32: 1>} : vector<8x128xi32>
    %c64_i32 = arith.constant 64 : i32
    %4 = vector.broadcast %c64_i32 : i32 to vector<8x128xi32>
    %5 = arith.cmpi sge, %3, %4 : vector<8x128xi32>
    %c96_i32 = arith.constant 96 : i32
    %6 = vector.broadcast %c96_i32 : i32 to vector<8x128xi32>
    %7 = arith.cmpi slt, %3, %6 : vector<8x128xi32>
    %8 = arith.andi %5, %7 : vector<8x128xi1>
    %cst = arith.constant 1.000000e+00 : f32
    %cst_1 = arith.constant 5.000000e-01 : f32
    %9 = vector.broadcast %cst : f32 to vector<8x128xf32>
    %10 = vector.broadcast %cst_1 : f32 to vector<8x128xf32>
    %11 = arith.select %8, %9, %10 : vector<8x128xi1>, vector<8x128xf32>
    %c0 = arith.constant 0 : index
    %c0_2 = arith.constant 0 : index
    %12 = vector.load %arg5[%c0, %c0_2] : memref<32x128xf32, #tpu.memory_space<vmem>>, vector<32x128xf32>
    %c0_3 = arith.constant 0 : index
    %c0_4 = arith.constant 0 : index
    %13 = vector.load %arg9[%c0_3, %c0_4] : memref<8x32xf32, #tpu.memory_space<vmem>>, vector<8x32xf32>
    %c0_5 = arith.constant 0 : index
    %c0_6 = arith.constant 0 : index
    %14 = vector.load %arg10[%c0_5, %c0_6] : memref<8x32xf32, #tpu.memory_space<vmem>>, vector<8x32xf32>
    %c0_7 = arith.constant 0 : index
    %c0_8 = arith.constant 0 : index
    %c0_9 = arith.constant 0 : index
    %15 = vector.load %arg2[%c0_7, %c0_8, %c0_9] : memref<1x8x128xf32, #tpu.memory_space<vmem>>, vector<1x8x128xf32>
    %16 = vector.shape_cast %15 : vector<1x8x128xf32> to vector<8x128xf32>
    %cst_10 = arith.constant dense<0.000000e+00> : vector<8x128xf32>
    %17 = tpu.matmul %13, %12, %cst_10 {dimension_numbers = #tpu.dot_dimension_numbers<[1], [0], [0], [1], [0, 0, 1, 1], [], []>} : vector<8x32xf32>, vector<32x128xf32>, vector<8x128xf32> -> vector<8x128xf32>
    %18 = arith.addf %16, %17 : vector<8x128xf32>
    %19 = arith.mulf %18, %11 : vector<8x128xf32>
    %20 = math.tanh %19 : vector<8x128xf32>
    %cst_11 = arith.constant 5.000000e-01 : f32
    %21 = vector.broadcast %cst_11 : f32 to vector<8x128xf32>
    %22 = arith.mulf %21, %20 : vector<8x128xf32>
    %cst_12 = arith.constant 5.000000e-01 : f32
    %23 = vector.broadcast %cst_12 : f32 to vector<8x128xf32>
    %24 = arith.addf %22, %23 : vector<8x128xf32>
    %25 = arith.select %8, %20, %24 : vector<8x128xi1>, vector<8x128xf32>
    %26 = vector.extract_strided_slice %25 {offsets = [0, 0], sizes = [8, 32], strides = [1, 1]} : vector<8x128xf32> to vector<8x32xf32>
    %27 = vector.extract_strided_slice %25 {offsets = [0, 32], sizes = [8, 32], strides = [1, 1]} : vector<8x128xf32> to vector<8x32xf32>
    %28 = vector.extract_strided_slice %25 {offsets = [0, 64], sizes = [8, 32], strides = [1, 1]} : vector<8x128xf32> to vector<8x32xf32>
    %29 = vector.extract_strided_slice %25 {offsets = [0, 96], sizes = [8, 32], strides = [1, 1]} : vector<8x128xf32> to vector<8x32xf32>
    %30 = arith.mulf %27, %14 : vector<8x32xf32>
    %31 = arith.mulf %26, %28 : vector<8x32xf32>
    %32 = arith.addf %30, %31 : vector<8x32xf32>
    %33 = math.tanh %32 : vector<8x32xf32>
    %34 = arith.mulf %29, %33 : vector<8x32xf32>
    %c0_13 = arith.constant 0 : index
    %c0_14 = arith.constant 0 : index
    %c0_15 = arith.constant 0 : index
    %35 = vector.load %arg6[%c0_13, %c0_14, %c0_15] : memref<1x8x32xf32, #tpu.memory_space<vmem>>, vector<1x8x32xf32>
    %36 = vector.shape_cast %35 : vector<1x8x32xf32> to vector<8x32xf32>
    %37 = vector.shape_cast %34 : vector<8x32xf32> to vector<1x8x32xf32>
    tpu.vector_store %arg6[%c0_13, %c0_14, %c0_15], %37 {strides = array<i32>} : memref<1x8x32xf32, #tpu.memory_space<vmem>>, vector<1x8x32xf32>,
    %c0_16 = arith.constant 0 : index
    %c0_17 = arith.constant 0 : index
    %38 = vector.load %arg9[%c0_16, %c0_17] : memref<8x32xf32, #tpu.memory_space<vmem>>, vector<8x32xf32>
    tpu.vector_store %arg9[%c0_16, %c0_17], %34 {strides = array<i32>} : memref<8x32xf32, #tpu.memory_space<vmem>>, vector<8x32xf32>,
    %c0_18 = arith.constant 0 : index
    %c0_19 = arith.constant 0 : index
    %39 = vector.load %arg10[%c0_18, %c0_19] : memref<8x32xf32, #tpu.memory_space<vmem>>, vector<8x32xf32>
    tpu.vector_store %arg10[%c0_18, %c0_19], %32 {strides = array<i32>} : memref<8x32xf32, #tpu.memory_space<vmem>>, vector<8x32xf32>,
    %c0_20 = arith.constant 0 : index
    %c0_21 = arith.constant 0 : index
    %40 = vector.load %arg9[%c0_20, %c0_21] : memref<8x32xf32, #tpu.memory_space<vmem>>, vector<8x32xf32>
    %c0_22 = arith.constant 0 : index
    %c0_23 = arith.constant 0 : index
    %41 = vector.load %arg7[%c0_22, %c0_23] : memref<8x32xf32, #tpu.memory_space<vmem>>, vector<8x32xf32>
    tpu.vector_store %arg7[%c0_22, %c0_23], %40 {strides = array<i32>} : memref<8x32xf32, #tpu.memory_space<vmem>>, vector<8x32xf32>,
    %c0_24 = arith.constant 0 : index
    %c0_25 = arith.constant 0 : index
    %42 = vector.load %arg10[%c0_24, %c0_25] : memref<8x32xf32, #tpu.memory_space<vmem>>, vector<8x32xf32>
    %c0_26 = arith.constant 0 : index
    %c0_27 = arith.constant 0 : index
    %43 = vector.load %arg8[%c0_26, %c0_27] : memref<8x32xf32, #tpu.memory_space<vmem>>, vector<8x32xf32>
    tpu.vector_store %arg8[%c0_26, %c0_27], %42 {strides = array<i32>} : memref<8x32xf32, #tpu.memory_space<vmem>>, vector<8x32xf32>,
    return
  }
  func.func @transform_0(%arg0: i32, %arg1: i32) -> (i32, i32, i32) {
    %c0_i32 = arith.constant 0 : i32
    %c0_i32_0 = arith.constant 0 : i32
    return %arg1, %arg0, %c0_i32 : i32, i32, i32
  }
  func.func @transform_1(%arg0: i32, %arg1: i32) -> (i32, i32) {
    %c0_i32 = arith.constant 0 : i32
    %c0_i32_0 = arith.constant 0 : i32
    return %arg0, %c0_i32 : i32, i32
  }
  func.func @transform_2(%arg0: i32, %arg1: i32) -> (i32, i32) {
    %c0_i32 = arith.constant 0 : i32
    %c0_i32_0 = arith.constant 0 : i32
    return %arg0, %c0_i32 : i32, i32
  }
  func.func @transform_3(%arg0: i32, %arg1: i32) -> (i32, i32) {
    %c0_i32 = arith.constant 0 : i32
    %c0_i32_0 = arith.constant 0 : i32
    %c0_i32_1 = arith.constant 0 : i32
    return %c0_i32, %c0_i32_0 : i32, i32
  }
  func.func @transform_4(%arg0: i32, %arg1: i32) -> (i32, i32, i32) {
    %c0_i32 = arith.constant 0 : i32
    %c0_i32_0 = arith.constant 0 : i32
    return %arg1, %arg0, %c0_i32 : i32, i32, i32
  }
  func.func @transform_5(%arg0: i32, %arg1: i32) -> (i32, i32) {
    %c0_i32 = arith.constant 0 : i32
    %c0_i32_0 = arith.constant 0 : i32
    return %arg0, %c0_i32 : i32, i32
  }
  func.func @transform_6(%arg0: i32, %arg1: i32) -> (i32, i32) {
    %c0_i32 = arith.constant 0 : i32
    %c0_i32_0 = arith.constant 0 : i32
    return %arg0, %c0_i32 : i32, i32
  }
}

</mosaic_0001>

<bundles_post_ra>
// kernel: lstm_pallas_seq.1
= control target key start
LH: loop header
LB: loop body
LE: loop exit
PB: predicated region body
PF: predicated region fallthrough
CT: control target
= control target key end

     0   :  { %12 = vsyncpa [#allocation5], 0  ;;  %v276_v3 = vmov 0.0|0.0   ;;  %vm277_vm0 = vmmov 0   ;;  %v278_v6 = vmov 0.0   ;;  %vm27_vm1 = vcmask 261120   ;;  %s376_s0 = inlined_call_operand.vmem [shape: f32[1,8,128], index: 0, kind: input, shape index: {}]   ;;  %s377_s1 = inlined_call_operand.vmem [shape: f32[8,32], index: 1, kind: input, shape index: {}]   ;;  %s378_s2 = inlined_call_operand.vmem [shape: f32[8,32], index: 2, kind: input, shape index: {}]   ;;  %s379_s3 = inlined_call_operand.vmem [shape: f32[32,128], index: 3, kind: input, shape index: {}]   ;;  %s380_s4 = inlined_call_operand.vmem [shape: f32[1,8,32], index: 4, kind: output, shape index: {0}]   ;;  %s381_s5 = inlined_call_operand.hbm [shape: f32[8,32], index: 5, kind: output, shape index: {1}]   ;;  %s382_s6 = inlined_call_operand.hbm [shape: f32[8,32], index: 6, kind: output, shape index: {2}]  }
   0x1   :  { %v37_v0 = vld [vmem:[%s379_s3] sm:$0xff]  ;;  %v38_v1 = vld [vmem:[%s379_s3 + $0x8] sm:$0xff]  ;;  %v39_v2 = vld [vmem:[%s379_s3 + $0x10] sm:$0xff]  ;;  %209 = vmatprep.subr.bf16.mxu0 %v276_v3  ;;  %206 = vmatprep.mubr.msk.f32.mxu0 %vm277_vm0, %v278_v6 }
   0x2   :  { %v210_v4 = vpack.c.bf16 %v38_v1, %v37_v0  ;;  %v40_v5 = vld [vmem:[%s379_s3 + $0x18] sm:$0xff]  ;;  %v26_v7 = vld [vmem:[%s377_s1] sm:$0xff] }
   0x3   :  { %v29_v8 = vld [vmem:[%s378_s2] sm:$0xff]  ;;  %28 = vst.msk [vmem:[#allocation2] sm:$0xff] %vm27_vm1, %v26_v7 }
   0x4   :  { %30 = vst.msk [vmem:[#allocation3] sm:$0xff] %vm27_vm1, %v29_v8 }
   0x5   :  { %13 = vsyncpa [#allocation7], 0  ;;  %211 = vmatpush3.bf16.msra.mxu0 %v210_v4  ;;  %v213_v9 = vpack.c.bf16 %v40_v5, %v39_v2  ;;  %v31_v11 = vlaneseq  ;;  %v43_v13 = vld [vmem:[%s376_s0] sm:$0xff]  ;;  %v279_v14 = vmov 0.5   ;;  %s280_s2 = smov 64   ;;  %s281_s9 = smov 32  }
   0x6   :  { %212 = vmatprep.subr.bf16.mxu0 %v276_v3  ;;  %s282_s0 = smov 96   ;;  %s283_s10 = smov [#allocation6]  }
   0x7   :  { %v32_v12 = vand.u32 127, %v31_v11  ;;  %s178_s11 = sshll.u32 %s283_s10, 4  ;;  %s179_s11 = int_to_ptr.vmem [resolvable:$true] %s178_s11 }
   0x8   :  { %s228_s12 = scalar_lea.vmem %s179_s11, 128  ;;  %p233_p1 = scmp.lt.s32.totalorder %s179_s11, %s179_s11 }
   0x9   :  { %214 = vmatpush3.bf16.msra.mxu0 %v213_v9  ;;  %vm33_vm2 = vcmp.ge.s32.totalorder %v32_v12, 64  ;;  %vm34_vm3 = vcmp.lt.s32.totalorder %v32_v12, 96  ;;  %p229_p0 = scmp.ne.s32.totalorder %s179_s11, %s228_s12  ;;  %p234_p2 = scmp.lt.s32.totalorder %s228_s12, %s228_s12 }
   0xa   :  { %v41_v10 = vld [vmem:[#allocation2] sm:$0xff]  ;;  %vm35_vm4 = vmand %vm33_vm2, %vm34_vm3 }
   0xb   :  { %v36_v15 = vsel %vm35_vm4, 1.0, %v279_v14  ;;  %v42_v24 = vld [vmem:[#allocation3] sm:$0xff]  ;;  %p235_p3 = por %p234_p2, %p233_p1 }
   0xc   :  { %207 = vmatmul.mubr.msk.f32.vlgmr.msra.gmra.mrb[0].mxu0 %vm27_vm1, %v41_v10 }
   0xd   :  { %p236_p4 = pnand %p235_p3, %p229_p0 }
  0xdf   :  { %v114_v16 = vpop.f32.mrb[0].mxu0 }
  0xe0   :  { %v118_v17 = vadd.f32 %v114_v16, %v43_v13  ;;  %v208_v18 = vpop.f32.mrb[1].mxu0 }
  0xe2   :  { %v119_v19 = vmul.f32 %v118_v17, %v36_v15 }
  0xe4   :  { %224 = vtanh.f32 %v119_v19 }
  0xee   :  { %v225_v20 = vpop.eup %224 }
  0xef   :  { %v121_v21 = vmul.f32 0.5, %v225_v20 }
  0xf1   :  { %v122_v22 = vadd.f32 0.5, %v121_v21 }
  0xf3   :  { %v123_v23 = vsel %vm35_vm4, %v225_v20, %v122_v22 }
  0xf4   :  { %130 = vrot.lane.b32.xlu0 %v123_v23, %s280_s2 }
  0xf8   :  { %125 = vrot.lane.b32.xlu0 %v42_v24, %s281_s9 }
 0x166   :  { %v131_v25 = vpop.permute.xlu0 %130 }
 0x167   :  { %v133_v26 = vmul.f32 %v131_v25, %v123_v23 }
 0x169   :  { %135 = vrot.lane.b32.xlu1 %v133_v26, %s281_s9 }
 0x16a   :  { %v126_v27 = vpop.permute.xlu0 %125 }
 0x16b   :  { %v128_v28 = vmul.f32 %v126_v27, %v123_v23 }
 0x1db   :  { %v136_v29 = vpop.permute.xlu1 %135 }
 0x1dc   :  { %v138_v30 = vadd.f32 %v136_v29, %v128_v28 }
 0x1de   :  { %226 = vtanh.f32 %v138_v30 }
 0x1e8   :  { %v227_v31 = vpop.eup %226 }
 0x1e9   :  { %141 = vrot.lane.b32.xlu1 %v227_v31, %s280_s2 }
 0x1ed   :  { %152 = vrot.lane.b32.xlu1 %v138_v30, %s282_s0 }
 0x25b   :  { %v142_v32 = vpop.permute.xlu1 %141 }
 0x25c   :  { %v144_v33 = vmul.f32 %v142_v32, %v123_v23 }
 0x25e   :  { %146 = vrot.lane.b32.xlu0 %v144_v33, %s281_s9 }
 0x25f   :  { %v153_v34 = vpop.permute.xlu1 %152 }
 0x260   :  { %155 = vst.msk [vmem:[#allocation3] sm:$0xff] %vm27_vm1, %v153_v34 }
 0x267   :  { %v158_v35 = vld [vmem:[#allocation3] sm:$0xff] }
 0x268   :  { %159 = vst.msk [vmem:[#allocation6] sm:$0xff] %vm27_vm1, %v158_v35 }
 0x269   :  { %239 = shalt.err (!%p236_p4)
}
 0x26a   :  { %s240_s15 = scalar_lea.hbm %s382_s6, 128 }
 0x26b   :  { %p241_p5 = scmp.ne.s32.totalorder %s382_s6, %s240_s15  ;;  %p244_p6 = scmp.lt.u32.totalorder %s240_s15, %s382_s6 }
 0x26d   :  { %p246_p7 = pnand %p244_p6, %p241_p5 }
 0x26f   :  { %249 = shalt.err (!%p246_p7)
}
 0x270   :  { %181 = dma.vmem_to_hbm [thread:$0]  %s179_s11, 128, %s382_s6, [#allocation7]  }
 0x271   :  { %s284_s24 = smov [#allocation4]  }
 0x272   :  { %s168_s25 = sshll.u32 %s284_s24, 4  ;;  %s169_s25 = int_to_ptr.vmem [resolvable:$true] %s168_s25 }
 0x273   :  { %s250_s26 = scalar_lea.vmem %s169_s25, 128  ;;  %p255_p9 = scmp.lt.s32.totalorder %s169_s25, %s169_s25 }
 0x274   :  { %p251_p8 = scmp.ne.s32.totalorder %s169_s25, %s250_s26  ;;  %p256_p10 = scmp.lt.s32.totalorder %s250_s26, %s250_s26 }
 0x276   :  { %p257_p11 = por %p256_p10, %p255_p9 }
 0x278   :  { %p258_p12 = pnand %p257_p11, %p251_p8 }
 0x2d0   :  { %v147_v36 = vpop.permute.xlu0 %146 }
 0x2d1   :  { %149 = vst.msk [vmem:[%s380_s4] sm:$0xff] %vm27_vm1, %v147_v36  ;;  %150 = vst.msk [vmem:[#allocation2] sm:$0xff] %vm27_vm1, %v147_v36 }
 0x2d8   :  { %v156_v37 = vld [vmem:[#allocation2] sm:$0xff] }
 0x2d9   :  { %157 = vst.msk [vmem:[#allocation4] sm:$0xff] %vm27_vm1, %v156_v37 }
 0x2da   :  { %261 = shalt.err (!%p258_p12)
}
 0x2db   :  { %s262_s28 = scalar_lea.hbm %s381_s5, 128 }
 0x2dc   :  { %p263_p13 = scmp.ne.s32.totalorder %s381_s5, %s262_s28  ;;  %p266_p0 = scmp.lt.u32.totalorder %s262_s28, %s381_s5 }
 0x2de   :  { %p268_p1 = pnand %p266_p0, %p263_p13 }
 0x2e0   :  { %271 = shalt.err (!%p268_p1)
}
 0x2e1   :  { %171 = dma.vmem_to_hbm [thread:$0]  %s169_s25, 128, %s381_s5, [#allocation5]  }
 0x2e2   :  { %272 = dma.done.wait [#allocation5], 128  }
 0x2e3   :  { %273 = vsyncadd [#allocation5], 4294967168 }
 0x2e4   :  { %274 = dma.done.wait [#allocation7], 128  }
 0x2e5   :  { %275 = vsyncadd [#allocation7], 4294967168 }
 0x2e6   :  { %190 = vsyncpa [#allocation5], 1 }
 0x2e7   :  { %191 = vsyncpa [#allocation7], 1 }

</bundles_post_ra>
